<compile_context>
chip_gen: v7x
topology: tpu7x:2x2x1
jax: 0.10.0
libtpu: 0.0.40
codegen_flags: <defaults>
</compile_context>

<pallas_src>
import jax
import jax.numpy as jnp
from jax.experimental import pallas as pl
from jax.experimental.pallas import tpu as pltpu


def bert_classifier_kernel(
    valid_len_ref,   # (b_tile, 1)        int32  VMEM (resident per batch tile)
    emb_ref,         # (b_tile, s_tile,H) bf16   VMEM (streamed over S)
    w_pool_ref,      # (H, H)             f32    VMEM (resident, synthetic pooler)
    b_pool_ref,      # (1, H)             f32    VMEM (resident)
    w_cls_ref,       # (H, C_pad)         f32    VMEM (resident, classifier.weight.T, lane-padded)
    b_cls_ref,       # (1, C_pad)         f32    VMEM (resident, classifier.bias, lane-padded)
    mask_out_ref,    # (b_tile, S)        f32    output: attention mask (resident over S)
    logits_ref,      # (b_tile, C_pad)    f32    output: padded logits (resident over S)
    acc_ref,         # (b_tile, H)        f32    scratch: masked-sum accumulator
    cnt_ref,         # (b_tile, 1)        f32    scratch: mask count accumulator
):
    s = pl.program_id(1)
    n_s = pl.num_programs(1)
    b_tile, s_tile, H = emb_ref.shape
    S = mask_out_ref.shape[1]

    vl = valid_len_ref[...]                                        # (b_tile, 1) int32

    # --- init + gen_attention_mask (full row, written once per batch tile) ---
    @pl.when(s == 0)
    def _init():
        acc_ref[...] = jnp.zeros_like(acc_ref)
        cnt_ref[...] = jnp.zeros_like(cnt_ref)
        full_pos = jax.lax.broadcasted_iota(jnp.int32, (b_tile, S), 1)
        mask_out_ref[...] = (full_pos < vl).astype(jnp.float32)

    # --- tile-local mask + streaming masked-sum reduction over S --------------
    pos = s * s_tile + jax.lax.broadcasted_iota(jnp.int32, (b_tile, s_tile), 1)
    tile_mask = (pos < vl).astype(jnp.float32)                     # (b_tile, s_tile)

    emb = emb_ref[...].astype(jnp.float32)                         # cast before VPU math
    acc_ref[...] += jnp.sum(emb * tile_mask[:, :, None], axis=1)   # (b_tile, H)
    cnt_ref[...] += jnp.sum(tile_mask, axis=1, keepdims=True)      # (b_tile, 1)

    # --- finalize: pooler dense + tanh, (identity) dropout, classifier --------
    @pl.when(s == n_s - 1)
    def _finalize():
        denom = jnp.maximum(cnt_ref[...], 1.0)                     # (b_tile, 1)
        pooled = acc_ref[...] / denom                              # (b_tile, H)
        pooler = jnp.tanh(
            jnp.dot(pooled, w_pool_ref[...], preferred_element_type=jnp.float32)
            + b_pool_ref[...]
        )                                                          # (b_tile, H)
        # dropout: eval mode => identity
        logits_ref[...] = (
            jnp.dot(pooler, w_cls_ref[...], preferred_element_type=jnp.float32)
            + b_cls_ref[...]
        )                                                          # (b_tile, C_pad)


def bert_classifier_forward(token_ids, valid_length, segment_ids, params,
                            *, b_tile=None, s_tile=None):
    """Glue: bf16 embedding gather in plain JAX, everything else in the kernel."""
    # Embedding stream kept in bf16 in HBM -> halves the dominant HBM read.
    emb = (params["tok_emb"][token_ids] + params["seg_emb"][segment_ids]).astype(
        jnp.bfloat16
    )  # (B, S, H)
    B, S, H = emb.shape
    C = params["w_cls"].shape[1]

    if b_tile is None:
        b_tile = B
    if s_tile is None:
        s_tile = S
    assert B % b_tile == 0 and S % s_tile == 0, "tile sizes must divide B and S"

    # Lane-dense classifier output: pad C up to a multiple of 128.
    c_pad = ((C + 127) // 128) * 128
    w_cls_p = jnp.zeros((H, c_pad), jnp.float32).at[:, :C].set(
        params["w_cls"].astype(jnp.float32))
    b_cls_p = jnp.zeros((1, c_pad), jnp.float32).at[:, :C].set(
        params["b_cls"].astype(jnp.float32))

    vl = valid_length.astype(jnp.int32).reshape(B, 1)

    # Explicit VMEM budget (only passed when it exceeds the default scoped limit):
    # double-buffered emb tiles + resident weights + outputs + scratch + slack.
    vmem_est = (
        2 * b_tile * s_tile * H * emb.dtype.itemsize
        + 2 * (H * H + H + H * c_pad + c_pad) * 4
        + 2 * (b_tile * S + b_tile * c_pad) * 4
        + (b_tile * H + b_tile) * 4
        + (1 << 20)
    )
    vmem_limit = vmem_est if vmem_est > (32 << 20) else None

    grid = (B // b_tile, S // s_tile)
    mask, logits_p = pl.pallas_call(
        bert_classifier_kernel,
        out_shape=(
            jax.ShapeDtypeStruct((B, S), jnp.float32),
            jax.ShapeDtypeStruct((B, c_pad), jnp.float32),
        ),
        grid_spec=pltpu.PrefetchScalarGridSpec(
            num_scalar_prefetch=0,
            grid=grid,
            in_specs=[
                pl.BlockSpec((b_tile, 1), lambda b, s: (b, 0)),          # valid_len
                pl.BlockSpec((b_tile, s_tile, H), lambda b, s: (b, s, 0)),  # emb stream
                pl.BlockSpec((H, H), lambda b, s: (0, 0)),               # w_pool (resident)
                pl.BlockSpec((1, H), lambda b, s: (0, 0)),               # b_pool (resident)
                pl.BlockSpec((H, c_pad), lambda b, s: (0, 0)),           # w_cls (resident)
                pl.BlockSpec((1, c_pad), lambda b, s: (0, 0)),           # b_cls (resident)
            ],
            out_specs=(
                pl.BlockSpec((b_tile, S), lambda b, s: (b, 0)),          # attention mask
                pl.BlockSpec((b_tile, c_pad), lambda b, s: (b, 0)),      # padded logits
            ),
            scratch_shapes=[
                pltpu.VMEM((b_tile, H), jnp.float32),   # masked-sum accumulator
                pltpu.VMEM((b_tile, 1), jnp.float32),   # mask-count accumulator
            ],
        ),
        compiler_params=pltpu.CompilerParams(
            dimension_semantics=("parallel", "arbitrary"),
            vmem_limit_bytes=vmem_limit,
        ),
    )(vl, emb, params["w_pool"], params["b_pool"], w_cls_p, b_cls_p)

    return mask, logits_p[:, :C]


def init_params(key, vocab_size, n_segments, hidden_size, num_classes):
    k1, k2, k3, k4 = jax.random.split(key, 4)
    return {
        # Embedding tables stored in bf16 (halves gather read + emb HBM stream).
        "tok_emb": (0.02 * jax.random.normal(k1, (vocab_size, hidden_size))).astype(jnp.bfloat16),
        "seg_emb": (0.02 * jax.random.normal(k2, (n_segments, hidden_size))).astype(jnp.bfloat16),
        "w_pool": 0.05 * jax.random.normal(k3, (hidden_size, hidden_size), jnp.float32),
        "b_pool": jnp.zeros((1, hidden_size), jnp.float32),
        "w_cls": 0.05 * jax.random.normal(k4, (hidden_size, num_classes), jnp.float32),
        "b_cls": jnp.zeros((1, num_classes), jnp.float32),
    }


if __name__ == "__main__":
    B, S, H, C = 2, 32, 32, 4     # small toy shapes; S tiled into 2 reduction steps
    VOCAB, N_SEG = 100, 2

    key = jax.random.PRNGKey(0)
    k_tok, k_seg, k_param = jax.random.split(key, 3)

    token_ids = jax.random.randint(k_tok, (B, S), 0, VOCAB, dtype=jnp.int32)
    segment_ids = jax.random.randint(k_seg, (B, S), 0, N_SEG, dtype=jnp.int32)
    valid_length = jnp.array([20, 32], dtype=jnp.int32)

    params = init_params(k_param, VOCAB, N_SEG, H, C)

    mask, logits = bert_classifier_forward(
        token_ids, valid_length, segment_ids, params, s_tile=16
    )
    jax.block_until_ready((mask, logits))

    # ---- pure-JAX reference (same bf16 embedding stream, f32 math) ----------
    emb_ref = (params["tok_emb"][token_ids] + params["seg_emb"][segment_ids]).astype(
        jnp.float32
    )
    ref_mask = (jnp.arange(S)[None, :] < valid_length[:, None]).astype(jnp.float32)
    denom = jnp.maximum(ref_mask.sum(axis=1, keepdims=True), 1.0)
    pooled = (emb_ref * ref_mask[:, :, None]).sum(axis=1) / denom
    pooler = jnp.tanh(pooled @ params["w_pool"] + params["b_pool"])
    ref_logits = pooler @ params["w_cls"] + params["b_cls"]

    assert mask.shape == (B, S) and logits.shape == (B, C)
    assert jnp.allclose(mask, ref_mask)
    assert jnp.allclose(logits, ref_logits, atol=1e-4, rtol=1e-4)

    print("KERNEL_OK")
</pallas_src>

<mosaic_0001>
module attributes {stable_mosaic.version = 11 : i64} {
  func.func @bert_classifier_kernel(%arg0: i32, %arg1: i32, %arg2: memref<2x1xi32, #tpu.memory_space<vmem>>, %arg3: memref<2x16x32xbf16, #tpu.memory_space<vmem>>, %arg4: memref<32x32xf32, #tpu.memory_space<vmem>>, %arg5: memref<1x32xf32, #tpu.memory_space<vmem>>, %arg6: memref<32x128xf32, #tpu.memory_space<vmem>>, %arg7: memref<1x128xf32, #tpu.memory_space<vmem>>, %arg8: memref<2x32xf32, #tpu.memory_space<vmem>>, %arg9: memref<2x128xf32, #tpu.memory_space<vmem>>, %arg10: memref<2x32xf32, #tpu.memory_space<vmem>>, %arg11: memref<2x1xf32, #tpu.memory_space<vmem>>) attributes {dimension_semantics = [#tpu.dimension_semantics<parallel>, #tpu.dimension_semantics<arbitrary>], iteration_bounds = array<i64: 1, 2>, scalar_prefetch = 0 : i64, scratch_operands = 2 : i64, tpu.core_type = #tpu.core_type<tc>, window_params = [{transform_indices = @transform_0, window_bounds = array<i64: 2, 1>}, {transform_indices = @transform_1, window_bounds = array<i64: 2, 16, 32>}, {pipeline_mode = #tpu.pipeline_mode<synchronous>, transform_indices = @transform_2, window_bounds = array<i64: 32, 32>}, {pipeline_mode = #tpu.pipeline_mode<synchronous>, transform_indices = @transform_3, window_bounds = array<i64: 1, 32>}, {pipeline_mode = #tpu.pipeline_mode<synchronous>, transform_indices = @transform_4, window_bounds = array<i64: 32, 128>}, {pipeline_mode = #tpu.pipeline_mode<synchronous>, transform_indices = @transform_5, window_bounds = array<i64: 1, 128>}, {transform_indices = @transform_6, window_bounds = array<i64: 2, 32>}, {transform_indices = @transform_7, window_bounds = array<i64: 2, 128>}]} {
    %c0 = arith.constant 0 : index
    %c0_0 = arith.constant 0 : index
    %0 = vector.load %arg2[%c0, %c0_0] : memref<2x1xi32, #tpu.memory_space<vmem>>, vector<2x1xi32>
    %c0_i32 = arith.constant 0 : i32
    %1 = arith.cmpi eq, %arg1, %c0_i32 : i32
    %2 = arith.extui %1 : i1 to i32
    %c0_i32_1 = arith.constant 0 : i32
    %3 = arith.cmpi ne, %2, %c0_i32_1 : i32
    scf.if %3 {
      %cst_15 = arith.constant 0.000000e+00 : f32
      %29 = vector.broadcast %cst_15 : f32 to vector<2x32xf32>
      %c0_16 = arith.constant 0 : index
      %c0_17 = arith.constant 0 : index
      %30 = vector.load %arg10[%c0_16, %c0_17] : memref<2x32xf32, #tpu.memory_space<vmem>>, vector<2x32xf32>
      tpu.vector_store %arg10[%c0_16, %c0_17], %29 {strides = array<i32>} : memref<2x32xf32, #tpu.memory_space<vmem>>, vector<2x32xf32>,
      %cst_18 = arith.constant 0.000000e+00 : f32
      %31 = vector.broadcast %cst_18 : f32 to vector<2x1xf32>
      %c0_19 = arith.constant 0 : index
      %c0_20 = arith.constant 0 : index
      %32 = vector.load %arg11[%c0_19, %c0_20] : memref<2x1xf32, #tpu.memory_space<vmem>>, vector<2x1xf32>
      tpu.vector_store %arg11[%c0_19, %c0_20], %31 {strides = array<i32>} : memref<2x1xf32, #tpu.memory_space<vmem>>, vector<2x1xf32>,
      %33 = tpu.iota {dimensions = array<i32: 1>} : vector<2x32xi32>
      %34 = vector.broadcast %0 : vector<2x1xi32> to vector<2x32xi32>
      %35 = arith.cmpi slt, %33, %34 : vector<2x32xi32>
      %36 = arith.extui %35 : vector<2x32xi1> to vector<2x32xi32>
      %37 = arith.sitofp %36 : vector<2x32xi32> to vector<2x32xf32>
      %c0_21 = arith.constant 0 : index
      %c0_22 = arith.constant 0 : index
      %38 = vector.load %arg8[%c0_21, %c0_22] : memref<2x32xf32, #tpu.memory_space<vmem>>, vector<2x32xf32>
      tpu.vector_store %arg8[%c0_21, %c0_22], %37 {strides = array<i32>} : memref<2x32xf32, #tpu.memory_space<vmem>>, vector<2x32xf32>,
    } else {
    }
    %c16_i32 = arith.constant 16 : i32
    %4 = arith.muli %arg1, %c16_i32 : i32
    %5 = tpu.iota {dimensions = array<i32: 1>} : vector<2x16xi32>
    %6 = vector.broadcast %4 : i32 to vector<2x16xi32>
    %7 = arith.addi %6, %5 : vector<2x16xi32>
    %8 = vector.broadcast %0 : vector<2x1xi32> to vector<2x16xi32>
    %9 = arith.cmpi slt, %7, %8 : vector<2x16xi32>
    %10 = arith.extui %9 : vector<2x16xi1> to vector<2x16xi32>
    %11 = arith.sitofp %10 : vector<2x16xi32> to vector<2x16xf32>
    %c0_2 = arith.constant 0 : index
    %c0_3 = arith.constant 0 : index
    %c0_4 = arith.constant 0 : index
    %12 = vector.load %arg3[%c0_2, %c0_3, %c0_4] : memref<2x16x32xbf16, #tpu.memory_space<vmem>>, vector<2x16x32xbf16>
    %13 = arith.extf %12 : vector<2x16x32xbf16> to vector<2x16x32xf32>
    %c0_5 = arith.constant 0 : index
    %c0_6 = arith.constant 0 : index
    %14 = vector.load %arg10[%c0_5, %c0_6] : memref<2x32xf32, #tpu.memory_space<vmem>>, vector<2x32xf32>
    %15 = vector.shape_cast %11 : vector<2x16xf32> to vector<2x16x1xf32>
    %16 = vector.broadcast %15 : vector<2x16x1xf32> to vector<2x16x32xf32>
    %17 = arith.mulf %13, %16 : vector<2x16x32xf32>
    %cst = arith.constant dense<0.000000e+00> : vector<2x32xf32>
    %18 = vector.multi_reduction <add>, %17, %cst [1] : vector<2x16x32xf32> to vector<2x32xf32>
    %19 = arith.addf %14, %18 : vector<2x32xf32>
    %c0_7 = arith.constant 0 : index
    %c0_8 = arith.constant 0 : index
    %20 = vector.load %arg10[%c0_7, %c0_8] : memref<2x32xf32, #tpu.memory_space<vmem>>, vector<2x32xf32>
    tpu.vector_store %arg10[%c0_7, %c0_8], %19 {strides = array<i32>} : memref<2x32xf32, #tpu.memory_space<vmem>>, vector<2x32xf32>,
    %c0_9 = arith.constant 0 : index
    %c0_10 = arith.constant 0 : index
    %21 = vector.load %arg11[%c0_9, %c0_10] : memref<2x1xf32, #tpu.memory_space<vmem>>, vector<2x1xf32>
    %cst_11 = arith.constant dense<0.000000e+00> : vector<2xf32>
    %22 = vector.multi_reduction <add>, %11, %cst_11 [1] : vector<2x16xf32> to vector<2xf32>
    %23 = vector.shape_cast %22 : vector<2xf32> to vector<2x1xf32>
    %24 = arith.addf %21, %23 : vector<2x1xf32>
    %c0_12 = arith.constant 0 : index
    %c0_13 = arith.constant 0 : index
    %25 = vector.load %arg11[%c0_12, %c0_13] : memref<2x1xf32, #tpu.memory_space<vmem>>, vector<2x1xf32>
    tpu.vector_store %arg11[%c0_12, %c0_13], %24 {strides = array<i32>} : memref<2x1xf32, #tpu.memory_space<vmem>>, vector<2x1xf32>,
    %c1_i32 = arith.constant 1 : i32
    %26 = arith.cmpi eq, %arg1, %c1_i32 : i32
    %27 = arith.extui %26 : i1 to i32
    %c0_i32_14 = arith.constant 0 : i32
    %28 = arith.cmpi ne, %27, %c0_i32_14 : i32
    scf.if %28 {
      %c0_15 = arith.constant 0 : index
      %c0_16 = arith.constant 0 : index
      %29 = vector.load %arg11[%c0_15, %c0_16] : memref<2x1xf32, #tpu.memory_space<vmem>>, vector<2x1xf32>
      %cst_17 = arith.constant 1.000000e+00 : f32
      %30 = vector.broadcast %cst_17 : f32 to vector<2x1xf32>
      %31 = arith.maximumf %29, %30 : vector<2x1xf32>
      %c0_18 = arith.constant 0 : index
      %c0_19 = arith.constant 0 : index
      %32 = vector.load %arg10[%c0_18, %c0_19] : memref<2x32xf32, #tpu.memory_space<vmem>>, vector<2x32xf32>
      %33 = vector.broadcast %31 : vector<2x1xf32> to vector<2x32xf32>
      %34 = arith.divf %32, %33 : vector<2x32xf32>
      %c0_20 = arith.constant 0 : index
      %c0_21 = arith.constant 0 : index
      %35 = vector.load %arg4[%c0_20, %c0_21] : memref<32x32xf32, #tpu.memory_space<vmem>>, vector<32x32xf32>
      %cst_22 = arith.constant dense<0.000000e+00> : vector<2x32xf32>
      %36 = tpu.matmul %34, %35, %cst_22 {dimension_numbers = #tpu.dot_dimension_numbers<[1], [0], [0], [1], [0, 0, 1, 1], [], []>} : vector<2x32xf32>, vector<32x32xf32>, vector<2x32xf32> -> vector<2x32xf32>
      %c0_23 = arith.constant 0 : index
      %c0_24 = arith.constant 0 : index
      %37 = vector.load %arg5[%c0_23, %c0_24] : memref<1x32xf32, #tpu.memory_space<vmem>>, vector<1x32xf32>
      %38 = vector.broadcast %37 : vector<1x32xf32> to vector<2x32xf32>
      %39 = arith.addf %36, %38 : vector<2x32xf32>
      %40 = math.tanh %39 : vector<2x32xf32>
      %c0_25 = arith.constant 0 : index
      %c0_26 = arith.constant 0 : index
      %41 = vector.load %arg6[%c0_25, %c0_26] : memref<32x128xf32, #tpu.memory_space<vmem>>, vector<32x128xf32>
      %cst_27 = arith.constant dense<0.000000e+00> : vector<2x128xf32>
      %42 = tpu.matmul %40, %41, %cst_27 {dimension_numbers = #tpu.dot_dimension_numbers<[1], [0], [0], [1], [0, 0, 1, 1], [], []>} : vector<2x32xf32>, vector<32x128xf32>, vector<2x128xf32> -> vector<2x128xf32>
      %c0_28 = arith.constant 0 : index
      %c0_29 = arith.constant 0 : index
      %43 = vector.load %arg7[%c0_28, %c0_29] : memref<1x128xf32, #tpu.memory_space<vmem>>, vector<1x128xf32>
      %44 = vector.broadcast %43 : vector<1x128xf32> to vector<2x128xf32>
      %45 = arith.addf %42, %44 : vector<2x128xf32>
      %c0_30 = arith.constant 0 : index
      %c0_31 = arith.constant 0 : index
      %46 = vector.load %arg9[%c0_30, %c0_31] : memref<2x128xf32, #tpu.memory_space<vmem>>, vector<2x128xf32>
      tpu.vector_store %arg9[%c0_30, %c0_31], %45 {strides = array<i32>} : memref<2x128xf32, #tpu.memory_space<vmem>>, vector<2x128xf32>,
    } else {
    }
    return
  }
  func.func @transform_0(%arg0: i32, %arg1: i32) -> (i32, i32) {
    %c0_i32 = arith.constant 0 : i32
    %c0_i32_0 = arith.constant 0 : i32
    return %arg0, %c0_i32 : i32, i32
  }
  func.func @transform_1(%arg0: i32, %arg1: i32) -> (i32, i32, i32) {
    %c0_i32 = arith.constant 0 : i32
    %c0_i32_0 = arith.constant 0 : i32
    return %arg0, %arg1, %c0_i32 : i32, i32, i32
  }
  func.func @transform_2(%arg0: i32, %arg1: i32) -> (i32, i32) {
    %c0_i32 = arith.constant 0 : i32
    %c0_i32_0 = arith.constant 0 : i32
    %c0_i32_1 = arith.constant 0 : i32
    return %c0_i32, %c0_i32_0 : i32, i32
  }
  func.func @transform_3(%arg0: i32, %arg1: i32) -> (i32, i32) {
    %c0_i32 = arith.constant 0 : i32
    %c0_i32_0 = arith.constant 0 : i32
    %c0_i32_1 = arith.constant 0 : i32
    return %c0_i32, %c0_i32_0 : i32, i32
  }
  func.func @transform_4(%arg0: i32, %arg1: i32) -> (i32, i32) {
    %c0_i32 = arith.constant 0 : i32
    %c0_i32_0 = arith.constant 0 : i32
    %c0_i32_1 = arith.constant 0 : i32
    return %c0_i32, %c0_i32_0 : i32, i32
  }
  func.func @transform_5(%arg0: i32, %arg1: i32) -> (i32, i32) {
    %c0_i32 = arith.constant 0 : i32
    %c0_i32_0 = arith.constant 0 : i32
    %c0_i32_1 = arith.constant 0 : i32
    return %c0_i32, %c0_i32_0 : i32, i32
  }
  func.func @transform_6(%arg0: i32, %arg1: i32) -> (i32, i32) {
    %c0_i32 = arith.constant 0 : i32
    %c0_i32_0 = arith.constant 0 : i32
    return %arg0, %c0_i32 : i32, i32
  }
  func.func @transform_7(%arg0: i32, %arg1: i32) -> (i32, i32) {
    %c0_i32 = arith.constant 0 : i32
    %c0_i32_0 = arith.constant 0 : i32
    return %arg0, %c0_i32 : i32, i32
  }
}

</mosaic_0001>

<bundles_post_ra>
// kernel: tpu_custom_call.1
= control target key start
LH: loop header
LB: loop body
LE: loop exit
PB: predicated region body
PF: predicated region fallthrough
CT: control target
= control target key end

     0   :  { %13 = vsyncpa [#allocation5], 0  ;;  %s1485_s0 = inlined_call_operand.vmem [shape: s32[2,1], index: 0, kind: input, shape index: {}]   ;;  %s1486_s1 = inlined_call_operand.hbm [shape: bf16[2,32,32], index: 1, kind: input, shape index: {}]   ;;  %s1487_s2 = inlined_call_operand.hbm [shape: f32[32,32], index: 2, kind: input, shape index: {}]   ;;  %s1488_s3 = inlined_call_operand.vmem [shape: f32[1,32], index: 3, kind: input, shape index: {}]   ;;  %s1489_s4 = inlined_call_operand.hbm [shape: f32[32,128], index: 4, kind: input, shape index: {}]   ;;  %s1490_s5 = inlined_call_operand.vmem [shape: f32[1,128], index: 5, kind: input, shape index: {}]   ;;  %s1491_s6 = inlined_call_operand.hbm [shape: f32[2,32], index: 6, kind: output, shape index: {0}]   ;;  %s1492_s7 = inlined_call_operand.hbm [shape: f32[2,128], index: 7, kind: output, shape index: {1}]  }
   0x1   :  { %15 = vsyncpa [#allocation5 + $0x1], 0 }
   0x2   :  { %16 = vsyncpa [#allocation8], 0 }
   0x3   :  { %17 = vsyncpa [#allocation6], 0 }
   0x4   :  { %18 = vsyncpa [#allocation12], 0  ;;  %s1231_s24 = smov 0   ;;  %s1233_s25 = smov 0  }
   0x5   :  { %s1235_s26 = smov 0   ;;  %s1237_s27 = smov 0  }
   0x6   :  { %s1239_s28 = smov 0   ;;  %s1241_s29 = smov 0  }
   0x7 LB: > { %s1498_s30 = sadd.s32 4294967295, %s1169_s29   ;;  %s33_s8 = sadd.s32 1, %s1165_s28  ;;  %s1169_s29 = sphi %s1241_s29, %s24_s29   ;;  %s1165_s28 = sphi %s1239_s28, %s1519_s28   ;;  %s1161_s27 = sphi %s1237_s27, %s1518_s27   ;;  %s1157_s26 = sphi %s1235_s26, %s1517_s26   ;;  %s1153_s25 = sphi %s1233_s25, %s1516_s25   ;;  %s1149_s24 = sphi %s1231_s24, %s1515_s24  }
   0x8   : > { %p34_p0 = scmp.ge.s32.totalorder %s33_s8, 2  ;;  %s71_s9 = sadd.s32 1, %s1157_s26 }
   0x9   : > { %p78_p1 = scmp.ne.s32.totalorder %s1157_s26, %s1153_s25  ;;  %p79_p2 = scmp.eq.s32.totalorder %s1169_s29, 0 }
   0xa   : > { %s1521_s8 = smov (%p34_p0, %s33_s8), 0  ;;  %p84_p4 = scmp.ne.s32.totalorder %s1153_s25, %s1149_s24 }
   0xb   : > { %1500 = sst [smem:[#allocation20_spill]] %s1521_s8  ;;  %p1267_p3 = por %p79_p2, %p78_p1 }
   0xc   : > { %s67_s11 = ssub.s32 %s1165_s28, %s1521_s8  ;;  %p1276_p5 = scmp.eq.s32.totalorder %s1498_s30, 0 }
   0xd   : > { %s1501_s10 = scalar_select %p1267_p3, 1, 0 }
   0xe   : > { %s1502_s12 = scalar_select %p1276_p5, 1, 0 }
   0xf   : > { %p69_p6 = scmp.eq.s32.totalorder %s67_s11, 0  ;;  %p801_p7 = scmp.ge.s32.totalorder %s1169_s29, 1 }
  0x10   : > { %p1283_p8 = por %p1276_p5, %p84_p4  ;;  %p231_p9 = scmp.lt.s32.totalorder %s1169_s29, 3 }
  0x11   : > { %s1289_s14 = scalar_select %p69_p6, %s1157_s26, %s71_s9  }
  0x12   : > { %s1503_s13 = scalar_select %p1283_p8, 1, 0 }
  0x13   : > { %1504 = sst [smem:[#allocation21_spill]] %s1289_s14  ;;  %p1291_p10 = pnand %p801_p7, %p231_p9 }
  0x14   : > { %s1171_s16 = smov [#allocation7]   ;;  %s1172_s19 = smov [#allocation9]  }
  0x15   : > { %s1505_s15 = scalar_select %p1291_p10, 1, 0 }
  0x16   : > { %p909_p11 = pneg %p1291_p10  ;;  %s250_s17 = sshll.u32 %s1171_s16, 4  ;;  %s251_s17 = int_to_ptr.vmem [resolvable:$true] %s250_s17 }
  0x17   : > { %s266_s20 = sshll.u32 %s1172_s19, 4  ;;  %s999_s23 = scalar_lea.hbm %s1487_s2, 512  ;;  %s1303_s20 = int_to_ptr.vmem [resolvable:$true] %s266_s20 }
  0x18   : > { %p1299_p12 = pnand %p909_p11, %p1276_p5  ;;  %p1000_p13 = scmp.ne.s32.totalorder %s1487_s2, %s999_s23 }
  0x19   : > { %p1006_p4 = scmp.lt.u32.totalorder %s999_s23, %s1487_s2 }
  0x1a   : > { %p1001_p0 = pneg %p1299_p12 }
  0x1c   : > { %p1002_p1 = pnand %p1001_p0, %p1000_p13 }
  0x1e   : > { %p1003_p2 = pneg %p1002_p1 }
  0x20   : > { %p1008_p6 = pnand %p1006_p4, %p1003_p2 }
  0x22   : > { %1011 = shalt.err (!%p1008_p6)
}
  0x23   : > { %s1012_s19 = scalar_lea.vmem %s251_s17, 512  ;;  %p1020_p5 = scmp.lt.s32.totalorder %s251_s17, %s251_s17 }
  0x24   : > { %p1013_p7 = scmp.ne.s32.totalorder %s251_s17, %s1012_s19  ;;  %p1021_p8 = scmp.lt.s32.totalorder %s1012_s19, %s1012_s19 }
  0x26   : > { %p1015_p9 = pnand %p1013_p7, %p1001_p0  ;;  %p1022_p10 = por %p1021_p8, %p1020_p5 }
  0x28   : > { %p1016_p11 = pneg %p1015_p9 }
  0x2a   : > { %p1023_p3 = pnand %p1022_p10, %p1016_p11 }
  0x2c   : > { %1026 = shalt.err (!%p1023_p3)
}
  0x2d   : > { %s1173_s21 = smov 128   ;;  %s1174_s22 = smov 8  }
  0x2e   : > { %912 = dma.hbm_to_vmem [thread:$0]  (!%p1299_p12), %s1487_s2, 512, %s251_s17, [#allocation8], %s1173_s21, %s1173_s21, %s1174_s22  }
  0x2f   : > { %s1027_s16 = scalar_lea.hbm %s1489_s4, 512 }
  0x30   : > { %p1028_p13 = scmp.ne.s32.totalorder %s1489_s4, %s1027_s16  ;;  %p1034_p8 = scmp.lt.u32.totalorder %s1027_s16, %s1489_s4 }
  0x32   : > { %p1030_p3 = pnand %p1028_p13, %p1001_p0 }
  0x34   : > { %p1031_p5 = pneg %p1030_p3 }
  0x36   : > { %p1036_p10 = pnand %p1034_p8, %p1031_p5 }
  0x38   : > { %1039 = shalt.err (!%p1036_p10)
}
  0x39   : > { %s1040_s17 = scalar_lea.vmem %s1303_s20, 512  ;;  %p1048_p6 = scmp.lt.s32.totalorder %s1303_s20, %s1303_s20 }
  0x3a   : > { %p1041_p1 = scmp.ne.s32.totalorder %s1303_s20, %s1040_s17  ;;  %p1049_p7 = scmp.lt.s32.totalorder %s1040_s17, %s1040_s17 }
  0x3c   : > { %p1043_p2 = pnand %p1041_p1, %p1001_p0  ;;  %p1050_p9 = por %p1049_p7, %p1048_p6 }
  0x3e   : > { %p1044_p4 = pneg %p1043_p2 }
  0x40   : > { %p1051_p11 = pnand %p1050_p9, %p1044_p4 }
  0x42   : > { %1054 = shalt.err (!%p1051_p11)
}
  0x43   : > { %915 = dma.hbm_to_vmem [thread:$0]  (!%p1299_p12), %s1489_s4, 512, %s1303_s20, [#allocation8], %s1173_s21, %s1173_s21, %s1174_s22  }
  0x44   : > { %p805_p13 = scmp.ge.s32.totalorder %s1169_s29, 2 }
  0x46   : > { %279 = sbr.rel (%p805_p13) target bundleno = 92 (0x5c), region = 36 }
  0x4d   : > { %s283_s14 = sand.u32 1, %s1157_s26   ;;  %s830_s23 = sshll.u32 %s1165_s28, 7 }
  0x4e   : > { %s806_s24 = sshll.u32 %s283_s14, 4  ;;  %s296_s11 = scalar_lea.hbm %s1486_s1, %s830_s23 }
  0x4f   : > { %p1507_p0 = scmp.ne.s32.totalorder %s1501_s10, 0  ;;  %s287_s21 = scalar_lea.vmem [#allocation4], %s806_s24 }
  0x50   : > { %s309_s22 = sshll.u32 %s287_s21, 4  ;;  %s1175_s19 = smov 256   ;;  %s310_s22 = int_to_ptr.vmem [resolvable:$true] %s309_s22 }
  0x51   : > { %s888_s20 = scalar_select %p1507_p0, [#allocation0], [#allocation15] }
  0x52   : > { %889 = sst [smem:[#allocation14]] (%p1507_p0), %s1175_s19  ;;  %s1176_s17 = smov 128  }
  0x53   : > { %s301_s16 = sld [smem:[%s888_s20]]   ;;  %s1177_s30 = smov 2  }
  0x54   : > { %890 = sst [smem:[#allocation14 + $0x1]] (%p1507_p0), %s1176_s17  ;;  %s1178_s8 = smov 64  }
  0x55   : > { %891 = sst [smem:[#allocation14 + $0x2]] (%p1507_p0), %s1177_s30  ;;  %s1179_s24 = smov 4  }
  0x56   : > { %892 = sst [smem:[#allocation14 + $0x3]] (%p1507_p0), %s1178_s8  ;;  %s284_s9 = scalar_lea.sflag [#allocation5], %s283_s14 }
  0x57   : > { %893 = sst [smem:[#allocation14 + $0x4]] (%p1507_p0), %s1178_s8  ;;  %s1180_s20 = smov [#allocation13]  }
  0x58   : > { %894 = sst [smem:[#allocation14 + $0x5]] (%p1507_p0), %s1179_s24 }
  0x59   : > { %s809_s23 = sshll.u32 %s301_s16, 26 }
  0x5a   : > { %s810_s18 = sadd.s32 134217728, %s809_s23 }
  0x5b   : > { %895 = dma.general (%p1507_p0), %s296_s11, 256, %s310_s22, %s284_s9, %s1180_s20, [#allocation14], %s810_s18, 0  }
  0x5c PF: > { %p1508_p12 = scmp.ne.s32.totalorder %s1505_s15, 0 }
  0x5d   : > { %s336_s21 = sand.u32 (!%p1508_p12), 1, %s1153_s25   ;;  %p1509_p3 = scmp.ne.s32.totalorder (!%p1508_p12), %s1503_s13, 0 }
  0x5e   : > { %334 = sbr.rel (%p1508_p12) target bundleno = 1196 (0x4ac), region = 44  ;;  %s1377_s19 = sshll.u32 (!%p1508_p12), %s336_s21, 4 }
  0x5f   : > { %s337_s17 = scalar_lea.sflag (!%p1508_p12), [#allocation5], %s336_s21  ;;  %s340_s16 = scalar_lea.vmem (!%p1508_p12), [#allocation4], %s1377_s19 }
  0x65   : > { %1132 = dma.done.wait (%p1509_p3), %s337_s17, 256  }
  0x66   : > { %1134 = vsyncadd (%p1509_p3), %s337_s17, 4294967040  ;;  %p1510_p5 = scmp.ne.s32.totalorder %s1502_s12, 0 }
  0x68   : > { %1136 = dma.done.wait (%p1510_p5), [#allocation8], 1024  }
  0x69   : > { %1138 = vsyncadd (%p1510_p5), [#allocation8], 4294966272  ;;  %v384_v0 = vld [vmem:[%s1485_s0] sm:$0x3]  ;;  %p815_p8 = scmp.ne.s32.totalorder %s1161_s27, 0 }
  0x6a   : > { %v1181_v1 = vmov (!%p815_p8), 0   ;;  %vm389_vm0 = vcmask (!%p815_p8), 254976   ;;  %vm391_vm1 = vcmask (!%p815_p8), 1024   ;;  %v1182_v2 = vmov (!%p815_p8), 0.0  }
  0x6b   : > { %388 = sbr.rel (%p815_p8) target bundleno = 239 (0xef), region = 60  ;;  %992 = vset.pattern.permute.xlu0 (!%p815_p8), %v1181_v1  ;;  %390 = vst.msk [vmem:[#allocation2] sm:$0x3] (!%p815_p8), %vm389_vm0, %v1182_v2  ;;  %v393_v3 = vlaneseq (!%p815_p8) }
  0x6c   : > { %396 = vperm.xlu0 (!%p815_p8), %992, %v384_v0   ;;  %392 = vst.msk [vmem:[#allocation3] sm:$0x3] (!%p815_p8), %vm391_vm1, %v1182_v2 }
  0x6d   : > { %v394_v4 = vand.u32 (!%p815_p8), 127, %v393_v3 }
  0xeb   : > { %v397_v5 = vpop.permute.xlu0 %396 }
  0xec   : > { %vm398_vm2 = vcmp.lt.s32.totalorder %v394_v4, %v397_v5 }
  0xed   : > { %v816_v6 = vsel %vm398_vm2, 1.0, %v1182_v2 }
  0xee   : > { %401 = vst.msk [vmem:[#allocation10] sm:$0x3] %vm389_vm0, %v816_v6 }
  0xef PF: > { %v1183_v7 = vmov 0   ;;  %v403_v8 = vlaneseq  ;;  %s817_s12 = sshll.u32 %s1161_s27, 4  ;;  %v1184_v15 = vmov 0.0   ;;  %vm476_vm4 = vcmask 123904   ;;  %v832_v21 = vld [vmem:[%s340_s16] sm:$0xff]   ;;  %v839_v24 = vld [vmem:[%s340_s16 + $0x8] sm:$0xff]  }
  0xf0   : > { %993 = vset.pattern.permute.xlu0 %v1183_v7  ;;  %v405_v10 = vstv %s817_s12  ;;  %v834_v22 = vunpack.c.h.bf16 %v832_v21  ;;  %v833_v23 = vunpack.c.l.bf16 %v832_v21  ;;  %vm448_vm5 = vcmask 261120   ;;  %v421_v52 = vld [vmem:[#allocation2] sm:$0x3]  ;;  %v475_v56 = vld [vmem:[#allocation3] sm:$0x3]  ;;  %p819_p10 = scmp.ne.s32.totalorder %s1161_s27, 1 }
  0xf1   : > { %408 = vperm.xlu0 %993, %v384_v0   ;;  %v404_v9 = vand.u32 127, %v403_v8  ;;  %v423_v11 = vshrl.u32 %v403_v8, 7  ;;  %v837_v29 = vunpack.c.l.bf16 %v839_v24  ;;  %v838_v30 = vunpack.c.h.bf16 %v839_v24  ;;  %v497_v62 = vld [vmem:[#allocation7] sm:$0xff] (!%p819_p10)  ;;  %v498_v63 = vld [vmem:[#allocation7 + $0x8] sm:$0xff] (!%p819_p10)  ;;  %v499_v0 = vld [vmem:[#allocation7 + $0x10] sm:$0xff] (!%p819_p10) }
  0xf2   : > { %vm469_vm6 = vcmask 1041409   ;;  %vm473_vm7 = vcmask 254976   ;;  %vm481_vm8 = vcmask 1024   ;;  %v1185_v60 = vmov (!%p819_p10), 0   ;;  %v500_v3 = vld [vmem:[#allocation7 + $0x18] sm:$0xff] (!%p819_p10) }
  0xf3   : > { %v406_v12 = vadd.s32 %v405_v10, %v404_v9  ;;  %v424_v13 = vsub.s32 0, %v423_v11  ;;  %v435_v18 = vsub.s32 1, %v423_v11  ;;  %v1186_v1 = vmov (!%p819_p10), 0.0|0.0   ;;  %v582_v10 = vld [vmem:[#allocation9] sm:$0xff] (!%p819_p10)  ;;  %v583_v11 = vld [vmem:[#allocation9 + $0x8] sm:$0xff] (!%p819_p10) }
  0xf4   : > { %872 = vmatprep.subr.bf16.mxu0 (!%p819_p10), %v1186_v1  ;;  %v873_v2 = vpack.c.bf16 (!%p819_p10), %v498_v63, %v497_v62  ;;  %vm1187_vm9 = vmmov (!%p819_p10), 0   ;;  %v1188_v4 = vmov (!%p819_p10), 0.0   ;;  %878 = vmatprep.subr.bf16.mxu1 (!%p819_p10), %v1186_v1  ;;  %v876_v5 = vpack.c.bf16 (!%p819_p10), %v500_v3, %v499_v0  ;;  %v822_v21 = vld [vmem:[%s1490_s5] ss:$0 sm:$0xff] (!%p819_p10) }
  0xf5   : > { %994 = vset.pattern.permute.xlu0 (!%p819_p10), %v1185_v60  ;;  %858 = vmatprep.mubr.msk.f32.mxu0 (!%p819_p10), %vm1187_vm9, %v1188_v4 }
  0xf6   : > { %869 = vmatprep.mubr.msk.f32.mxu1 (!%p819_p10), %vm1187_vm9, %v1188_v4  ;;  %874 = vmatpush3.bf16.msra.mxu0 (!%p819_p10), %v873_v2 }
  0xf7   : > { %875 = vmatprep.subr.bf16.mxu0 (!%p819_p10), %v1186_v1 }
  0xfa   : > { %877 = vmatpush3.bf16.msra.mxu0 (!%p819_p10), %v876_v5 }
 0x170   : > { %v409_v14 = vpop.permute.xlu0 %408 }
 0x171   : > { %vm410_vm3 = vcmp.lt.s32.totalorder %v406_v12, %v409_v14  ;;  %v584_v12 = vld [vmem:[#allocation9 + $0x10] sm:$0xff] (!%p819_p10)  ;;  %v585_v14 = vld [vmem:[#allocation9 + $0x18] sm:$0xff] (!%p819_p10) }
 0x172   : > { %v818_v16 = vsel %vm410_vm3, 1.0, %v1184_v15  ;;  %v882_v15 = vpack.c.bf16 (!%p819_p10), %v585_v14, %v584_v12 }
 0x173   : > { %v425_v17 = vrot.slane %v818_v16, %v424_v13  ;;  %v436_v19 = vrot.slane %v818_v16, %v435_v18  ;;  %v477_v20 = vsel %vm476_vm4, %v818_v16, 0.0  ;;  %v879_v13 = vpack.c.bf16 (!%p819_p10), %v583_v11, %v582_v10  ;;  %v820_v16 = vld [vmem:[%s1488_s3] ss:$0 sm:$0xff] (!%p819_p10) }
 0x175   : > { %431 = vbcast.lane.b32.xlu1 %v425_v17, 264  ;;  %427 = vbcast.lane.b32.xlu0 %v425_v17, 256 }
 0x176   : > { %880 = vmatpush3.bf16.msra.mxu1 (!%p819_p10), %v879_v13 }
 0x177   : > { %881 = vmatprep.subr.bf16.mxu1 (!%p819_p10), %v1186_v1 }
 0x179   : > { %438 = vbcast.lane.b32.xlu1 %v436_v19, 256  ;;  %442 = vbcast.lane.b32.xlu0 %v436_v19, 264 }
 0x17a   : > { %883 = vmatpush3.bf16.msra.mxu1 (!%p819_p10), %v882_v15 }
 0x19d   : > { %478 = vadd.xlane.f32.xlu1 %v477_v20 }
 0x1e7   : > { %v432_v25 = vpop.permute.xlu1 %431  ;;  %v428_v26 = vpop.permute.xlu0 %427 }
 0x1e8   : > { %v445_v27 = vmul.f32 %v834_v22, %v432_v25  ;;  %v444_v28 = vmul.f32 %v833_v23, %v428_v26 }
 0x1ea   : > { %v450_v31 = vsel %vm448_vm5, %v445_v27, 0.0  ;;  %v449_v32 = vsel %vm448_vm5, %v444_v28, 0.0 }
 0x1eb   : > { %v451_v33 = vadd.f32 %v450_v31, %v449_v32  ;;  %v439_v34 = vpop.permute.xlu1 %438  ;;  %v443_v35 = vpop.permute.xlu0 %442 }
 0x1ec   : > { %v446_v36 = vmul.f32 %v837_v29, %v439_v34  ;;  %v447_v37 = vmul.f32 %v838_v30, %v443_v35 }
 0x1ed   : > { %v452_v38 = vrot.slane %v451_v33, 4 }
 0x1ee   : > { %v458_v39 = vsel %vm448_vm5, %v446_v36, 0.0  ;;  %v459_v40 = vsel %vm448_vm5, %v447_v37, 0.0 }
 0x1ef   : > { %v453_v41 = vadd.f32 %v452_v38, %v451_v33  ;;  %v460_v42 = vadd.f32 %v459_v40, %v458_v39 }
 0x1f1   : > { %v454_v43 = vrot.slane %v453_v41, 2  ;;  %v461_v44 = vrot.slane %v460_v42, 4 }
 0x1f3   : > { %v455_v45 = vadd.f32 %v454_v43, %v453_v41  ;;  %v462_v46 = vadd.f32 %v461_v44, %v460_v42 }
 0x1f5   : > { %v463_v47 = vrot.slane %v462_v46, 2  ;;  %v456_v48 = vrot.slane %v455_v45, 1 }
 0x1f7   : > { %v464_v49 = vadd.f32 %v463_v47, %v462_v46  ;;  %v457_v51 = vadd.f32 %v456_v48, %v455_v45 }
 0x1f9   : > { %v465_v50 = vrot.slane %v464_v49, 1 }
 0x1fb   : > { %v466_v53 = vadd.f32 %v465_v50, %v464_v49 }
 0x1fd   : > { %v470_v54 = vsel %vm469_vm6, %v466_v53, %v457_v51 }
 0x1fe   : > { %v472_v55 = vadd.f32 %v470_v54, %v421_v52 }
 0x200   : > { %474 = vst.msk [vmem:[#allocation2] sm:$0x3] %vm473_vm7, %v472_v55 }
 0x207   : > { %v489_v7 = vld [vmem:[#allocation2] sm:$0x3] (!%p819_p10) }
 0x227   : > { %486 = sbr.rel (%p819_p10) target bundleno = 1148 (0x47c), region = 64 }
 0x22a   : > { %v479_v57 = vpop.xlane.xlu1 %478 }
 0x22b   : > { %v480_v58 = vadd.f32 %v479_v57, %v475_v56 }
 0x22d   : > { %482 = vst.msk [vmem:[#allocation3] sm:$0x3] %vm481_vm8, %v480_v58 }
 0x234   : > { %v487_v59 = vld [vmem:[#allocation3] sm:$0x3] }
 0x235   : > { %v488_v61 = vmax.f32 %v487_v59, 1.0 }
 0x237   : > { %492 = vperm.xlu0 %994, %v488_v61  }
 0x2b6   : > { %v493_v6 = vpop.permute.xlu0 %492 }
 0x2b7   : > { %995 = vrcp.f32 %v493_v6 }
 0x2c1   : > { %v996_v8 = vpop.eup %995 }
 0x2c2   : > { %v496_v9 = vmul.f32 %v996_v8, %v489_v7 }
 0x2c4   : > { %859 = vmatmul.mubr.msk.f32.vlgmr.msra.gmra.mrb[0].mxu0 %vm448_vm5, %v496_v9 }
 0x397   : > { %v577_v17 = vpop.f32.mrb[0].mxu0 }
 0x398   : > { %v578_v18 = vadd.f32 %v820_v16, %v577_v17  ;;  %v860_v19 = vpop.f32.mrb[1].mxu0 }
 0x39a   : > { %997 = vtanh.f32 %v578_v18 }
 0x3a4   : > { %v998_v20 = vpop.eup %997 }
 0x3a5   : > { %870 = vmatmul.mubr.msk.f32.vlgmr.msra.gmra.mrb[0].mxu1 %vm448_vm5, %v998_v20 }
 0x478   : > { %v662_v22 = vpop.f32.mrb[0].mxu1 }
 0x479   : > { %v663_v23 = vadd.f32 %v822_v21, %v662_v22  ;;  %v871_v24 = vpop.f32.mrb[1].mxu1 }
 0x47b   : > { %666 = vst [vmem:[#allocation11] sm:$0x3] %v663_v23 }
 0x47c PF: > { %s1511_s22 = sadd.s32 4294967295, %s1169_s29   ;;  %s1189_s8 = smov [#allocation10]  }
 0x47d   : > { %p1412_p1 = scmp.eq.s32.totalorder %s1511_s22, 1  ;;  %s676_s23 = sshll.u32 %s1189_s8, 4  ;;  %s677_s23 = int_to_ptr.vmem [resolvable:$true] %s676_s23 }
 0x47e   : > { %s1190_s24 = smov [#allocation11]   ;;  %s1055_s9 = scalar_lea.vmem %s677_s23, 32 }
 0x47f   : > { %s689_s18 = sshll.u32 %s1190_s24, 4  ;;  %p1056_p2 = scmp.ne.s32.totalorder %s677_s23, %s1055_s9  ;;  %s1416_s18 = int_to_ptr.vmem [resolvable:$true] %s689_s18 }
 0x480   : > { %p1062_p7 = scmp.lt.s32.totalorder %s677_s23, %s677_s23  ;;  %p1063_p9 = scmp.lt.s32.totalorder %s1055_s9, %s1055_s9 }
 0x481   : > { %p1057_p4 = pnand %p1056_p2, %p1412_p1 }
 0x482   : > { %p1064_p11 = por %p1063_p9, %p1062_p7 }
 0x483   : > { %p1058_p6 = pneg %p1057_p4 }
 0x485   : > { %p1065_p13 = pnand %p1064_p11, %p1058_p6 }
 0x487   : > { %1068 = shalt.err (!%p1065_p13)
}
 0x488   : > { %s1069_s19 = scalar_lea.hbm %s1491_s6, 32 }
 0x489   : > { %p1070_p0 = scmp.ne.s32.totalorder %s1491_s6, %s1069_s19  ;;  %p1075_p5 = scmp.lt.u32.totalorder %s1069_s19, %s1491_s6 }
 0x48b   : > { %p1071_p12 = pnand %p1070_p0, %p1412_p1 }
 0x48d   : > { %p1072_p3 = pneg %p1071_p12 }
 0x48f   : > { %p1077_p8 = pnand %p1075_p5, %p1072_p3 }
 0x491   : > { %1080 = shalt.err (!%p1077_p8)
}
 0x492   : > { %902 = dma.vmem_to_hbm [thread:$0]  (%p1412_p1), %s677_s23, 32, %s1491_s6, [#allocation6]  }
 0x493   : > { %s1081_s13 = scalar_lea.vmem %s1416_s18, 32  ;;  %p1088_p6 = scmp.lt.s32.totalorder %s1416_s18, %s1416_s18 }
 0x494   : > { %p1082_p10 = scmp.ne.s32.totalorder %s1416_s18, %s1081_s13  ;;  %p1089_p7 = scmp.lt.s32.totalorder %s1081_s13, %s1081_s13 }
 0x496   : > { %p1083_p2 = pnand %p1082_p10, %p1412_p1  ;;  %p1090_p9 = por %p1089_p7, %p1088_p6 }
 0x498   : > { %p1084_p4 = pneg %p1083_p2 }
 0x49a   : > { %p1091_p11 = pnand %p1090_p9, %p1084_p4 }
 0x49c   : > { %1094 = shalt.err (!%p1091_p11)
}
 0x49d   : > { %s1095_s22 = scalar_lea.hbm %s1492_s7, 32 }
 0x49e   : > { %p1096_p13 = scmp.ne.s32.totalorder %s1492_s7, %s1095_s22  ;;  %p1101_p3 = scmp.lt.u32.totalorder %s1095_s22, %s1492_s7 }
 0x4a0   : > { %p1097_p0 = pnand %p1096_p13, %p1412_p1 }
 0x4a2   : > { %p1098_p12 = pneg %p1097_p0 }
 0x4a4   : > { %p1103_p5 = pnand %p1101_p3, %p1098_p12 }
 0x4a6   : > { %1106 = shalt.err (!%p1103_p5)
}
 0x4a7   : > { %904 = dma.vmem_to_hbm [thread:$0]  (%p1412_p1), %s1416_s18, 32, %s1492_s7, [#allocation12]  }
 0x4a8   : > { %1140 = dma.done.wait (%p1412_p1), [#allocation6], 32  }
 0x4a9   : > { %1142 = vsyncadd (%p1412_p1), [#allocation6], 4294967264 }
 0x4aa   : > { %1144 = dma.done.wait (%p1412_p1), [#allocation12], 32  }
 0x4ab   : > { %1146 = vsyncadd (%p1412_p1), [#allocation12], 4294967264 }
 0x4ac PF: > { %s24_s29 = sadd.s32 1, %s1169_s29   ;;  %s1513_s19 = sld [smem:[#allocation21_spill]] }
 0x4ad   : > { %p21_p8 = scmp.ge.s32.totalorder %s24_s29, 4   ;;  %s1514_s18 = sld [smem:[#allocation20_spill]] }
 0x4ae   : > { %s1515_s24 = smov %s1153_s25  ;;  %s1516_s25 = smov %s1157_s26 }
 0x4af   : > { %s1518_s27 = smov %s1165_s28  ;;  %23 = sbr.rel (!%p21_p8) target bundleno = 7 (0x7), region = 115 }
 0x4b2   : > { %s1517_s26 = smov %s1513_s19 }
 0x4b3   : > { %s1519_s28 = smov %s1514_s18 }
 0x4b6   :  { %706 = vsyncpa [#allocation5], 1 }
 0x4b7   :  { %708 = vsyncpa [#allocation5 + $0x1], 1 }
 0x4b8   :  { %709 = vsyncpa [#allocation8], 1 }
 0x4b9   :  { %710 = vsyncpa [#allocation6], 1 }
 0x4ba   :  { %712 = vsyncpa [#allocation6 + $0x1], 1 }
 0x4bb   :  { %713 = vsyncpa [#allocation12], 1 }

</bundles_post_ra>
